<compile_context>
chip_gen: v6e
topology: v6e:2x2x1
jax: 0.10.0
libtpu: 0.0.40
codegen_flags: <defaults>
</compile_context>

<pallas_src>
import jax
import jax.numpy as jnp
from jax.experimental import pallas as pl
from jax.experimental.pallas import tpu as pltpu


def _target_unit_kernel(pn_ref, emb_ref, pe_ref, w_ref, b_ref, out_ref):
    """One grid step == one batch tile of TB rows.

    pn_ref  : (TB, 1)    int32  player_num tile
    emb_ref : (TB, K)    f32    query embedding tile
    pe_ref  : (TB, N, E) f32    player_embedding tile
    w_ref   : (E, K)     f32    key_fc weight (shared across grid)
    b_ref   : (1, K)     f32    key_fc bias   (shared across grid)
    out_ref : (TB, N)    f32    logits tile
    """
    tb, n, _ = pe_ref.shape

    q = emb_ref[...]                                                  # (TB, K)

    # v[b, e] = sum_k q[b, k] * w[e, k]   -- one (TB,K)x(E,K)^T MXU matmul/tile
    v = jax.lax.dot_general(
        q, w_ref[...],
        dimension_numbers=(((1,), (1,)), ((), ())),
        preferred_element_type=jnp.float32)                           # (TB, E)

    # c[b] = <q[b, :], bias>              -- VPU multiply + lane reduce
    c = jnp.sum(q * b_ref[...], axis=-1, keepdims=True)               # (TB, 1)

    # logits[b, n] = sum_e pe[b, n, e] * v[b, e] + c[b]
    # VPU multiply + XLU lane reduce; the (N, K) key tensor is never built.
    logits = jnp.sum(pe_ref[...] * v[:, None, :], axis=-1) + c        # (TB, N)

    # sequence_mask(player_num): valid where player index < player_num[b]
    idx = jax.lax.broadcasted_iota(jnp.int32, (tb, n), 1)
    valid = idx < pn_ref[...]                                         # (TB, N)
    out_ref[...] = jnp.where(valid, logits, jnp.float32(-1.0e9))


def target_unit_head(embedding, player_embedding, player_num, w, bias,
                     *, block_b=128):
    """Pallas implementation of TargetUnitHead.forward.

    embedding        : (B, K) f32
    player_embedding : (B, N, E) f32
    player_num       : (B,) int
    w                : (E, K) f32   (key = player_embedding @ w + bias)
    bias             : (K,)  f32
    returns          : (B, N) f32 logits (-1e9 where n >= player_num[b])
    """
    B, N, E = player_embedding.shape
    Ew, K = w.shape
    assert Ew == E and embedding.shape == (B, K) and bias.shape == (K,)

    # Batch tile: whole batch in one step when small, else a sublane-aligned
    # tile of `block_b` rows (must be a multiple of 8).
    if B <= block_b:
        tb = B
    else:
        tb = (block_b // 8) * 8
    num_tiles = pl.cdiv(B, tb)
    Bp = num_tiles * tb
    if Bp != B:
        pad = Bp - B
        embedding = jnp.pad(embedding, ((0, pad), (0, 0)))
        player_embedding = jnp.pad(player_embedding, ((0, pad), (0, 0), (0, 0)))
        player_num = jnp.pad(player_num, ((0, pad),))

    pn2 = player_num.astype(jnp.int32).reshape(Bp, 1)
    bias2 = bias.reshape(1, K)

    out = pl.pallas_call(
        _target_unit_kernel,
        out_shape=jax.ShapeDtypeStruct((Bp, N), jnp.float32),
        grid=(num_tiles,),
        in_specs=[
            pl.BlockSpec((tb, 1), lambda i: (i, 0)),        # player_num
            pl.BlockSpec((tb, K), lambda i: (i, 0)),        # query embedding
            pl.BlockSpec((tb, N, E), lambda i: (i, 0, 0)),  # player_embedding
            pl.BlockSpec((E, K), lambda i: (0, 0)),         # key_fc weight
            pl.BlockSpec((1, K), lambda i: (0, 0)),         # key_fc bias
        ],
        out_specs=pl.BlockSpec((tb, N), lambda i: (i, 0)),
        compiler_params=pltpu.CompilerParams(
            dimension_semantics=("parallel",)),
    )(pn2, embedding, player_embedding, w, bias2)

    return out[:B] if Bp != B else out


def _reference(embedding, player_embedding, player_num, w, bias):
    key = player_embedding @ w + bias                      # (B, N, K)
    logits = jnp.sum(embedding[:, None, :] * key, axis=2)  # (B, N)
    N = player_embedding.shape[1]
    mask = jnp.arange(N)[None, :] < player_num[:, None]
    return jnp.where(mask, logits, jnp.float32(-1.0e9))


if __name__ == "__main__":
    # Small shapes consistent with the module:
    #   batch=2, max_players(N)=8, entity_embedding_dim=32, key_dim=32
    B, N, E, K = 2, 8, 32, 32

    root = jax.random.PRNGKey(0)
    k_emb, k_pe, k_w, k_b = jax.random.split(root, 4)

    embedding = jax.random.normal(k_emb, (B, K), dtype=jnp.float32)
    player_embedding = jax.random.normal(k_pe, (B, N, E), dtype=jnp.float32)
    player_num = jnp.array([5, 8], dtype=jnp.int32)

    # Deterministic fc_block (nn.Linear(E, K)) parameters.
    w = jax.random.normal(k_w, (E, K), dtype=jnp.float32) / jnp.sqrt(jnp.float32(E))
    bias = 0.01 * jax.random.normal(k_b, (K,), dtype=jnp.float32)

    out = target_unit_head(embedding, player_embedding, player_num, w, bias)
    out = jax.block_until_ready(out)

    expected = _reference(embedding, player_embedding, player_num, w, bias)
    assert out.shape == (B, N) and out.dtype == jnp.float32
    assert jnp.allclose(out, expected, atol=1e-3, rtol=1e-3), "mismatch vs reference"

    # Also exercise the batch-tiled + padded grid path (TB=8, B not a multiple).
    B2 = 10
    k_emb2, k_pe2 = jax.random.split(jax.random.PRNGKey(1), 2)
    embedding2 = jax.random.normal(k_emb2, (B2, K), dtype=jnp.float32)
    player_embedding2 = jax.random.normal(k_pe2, (B2, N, E), dtype=jnp.float32)
    player_num2 = jnp.arange(1, B2 + 1, dtype=jnp.int32) % (N + 1)

    out2 = target_unit_head(embedding2, player_embedding2, player_num2, w, bias,
                            block_b=8)
    out2 = jax.block_until_ready(out2)
    expected2 = _reference(embedding2, player_embedding2, player_num2, w, bias)
    assert out2.shape == (B2, N)
    assert jnp.allclose(out2, expected2, atol=1e-3, rtol=1e-3), "tiled mismatch"

    print("KERNEL_OK")
</pallas_src>

<mosaic_0001>
module attributes {stable_mosaic.version = 11 : i64} {
  func.func @_target_unit_kernel(%arg0: i32, %arg1: memref<2x1xi32, #tpu.memory_space<vmem>>, %arg2: memref<2x32xf32, #tpu.memory_space<vmem>>, %arg3: memref<2x8x32xf32, #tpu.memory_space<vmem>>, %arg4: memref<32x32xf32, #tpu.memory_space<vmem>>, %arg5: memref<1x32xf32, #tpu.memory_space<vmem>>, %arg6: memref<2x8xf32, #tpu.memory_space<vmem>>) attributes {dimension_semantics = [#tpu.dimension_semantics<parallel>], iteration_bounds = array<i64: 1>, scalar_prefetch = 0 : i64, scratch_operands = 0 : i64, tpu.core_type = #tpu.core_type<tc>, window_params = [{transform_indices = @transform_0, window_bounds = array<i64: 2, 1>}, {transform_indices = @transform_1, window_bounds = array<i64: 2, 32>}, {transform_indices = @transform_2, window_bounds = array<i64: 2, 8, 32>}, {pipeline_mode = #tpu.pipeline_mode<synchronous>, transform_indices = @transform_3, window_bounds = array<i64: 32, 32>}, {pipeline_mode = #tpu.pipeline_mode<synchronous>, transform_indices = @transform_4, window_bounds = array<i64: 1, 32>}, {transform_indices = @transform_5, window_bounds = array<i64: 2, 8>}]} {
    %c0 = arith.constant 0 : index
    %c0_0 = arith.constant 0 : index
    %0 = vector.load %arg2[%c0, %c0_0] : memref<2x32xf32, #tpu.memory_space<vmem>>, vector<2x32xf32>
    %c0_1 = arith.constant 0 : index
    %c0_2 = arith.constant 0 : index
    %1 = vector.load %arg4[%c0_1, %c0_2] : memref<32x32xf32, #tpu.memory_space<vmem>>, vector<32x32xf32>
    %cst = arith.constant dense<0.000000e+00> : vector<2x32xf32>
    %2 = tpu.matmul %0, %1, %cst {dimension_numbers = #tpu.dot_dimension_numbers<[1], [1], [0], [0], [0, 0, 1, 0], [], []>} : vector<2x32xf32>, vector<32x32xf32>, vector<2x32xf32> -> vector<2x32xf32>
    %c0_3 = arith.constant 0 : index
    %c0_4 = arith.constant 0 : index
    %3 = vector.load %arg5[%c0_3, %c0_4] : memref<1x32xf32, #tpu.memory_space<vmem>>, vector<1x32xf32>
    %4 = vector.broadcast %3 : vector<1x32xf32> to vector<2x32xf32>
    %5 = arith.mulf %0, %4 : vector<2x32xf32>
    %cst_5 = arith.constant dense<0.000000e+00> : vector<2xf32>
    %6 = vector.multi_reduction <add>, %5, %cst_5 [1] : vector<2x32xf32> to vector<2xf32>
    %7 = vector.shape_cast %6 : vector<2xf32> to vector<2x1xf32>
    %c0_6 = arith.constant 0 : index
    %c0_7 = arith.constant 0 : index
    %c0_8 = arith.constant 0 : index
    %8 = vector.load %arg3[%c0_6, %c0_7, %c0_8] : memref<2x8x32xf32, #tpu.memory_space<vmem>>, vector<2x8x32xf32>
    %9 = vector.shape_cast %2 : vector<2x32xf32> to vector<2x1x32xf32>
    %10 = vector.broadcast %9 : vector<2x1x32xf32> to vector<2x8x32xf32>
    %11 = arith.mulf %8, %10 : vector<2x8x32xf32>
    %cst_9 = arith.constant dense<0.000000e+00> : vector<2x8xf32>
    %12 = vector.multi_reduction <add>, %11, %cst_9 [2] : vector<2x8x32xf32> to vector<2x8xf32>
    %13 = vector.broadcast %7 : vector<2x1xf32> to vector<2x8xf32>
    %14 = arith.addf %12, %13 : vector<2x8xf32>
    %15 = tpu.iota {dimensions = array<i32: 1>} : vector<2x8xi32>
    %c0_10 = arith.constant 0 : index
    %c0_11 = arith.constant 0 : index
    %16 = vector.load %arg1[%c0_10, %c0_11] : memref<2x1xi32, #tpu.memory_space<vmem>>, vector<2x1xi32>
    %17 = vector.broadcast %16 : vector<2x1xi32> to vector<2x8xi32>
    %18 = arith.cmpi slt, %15, %17 : vector<2x8xi32>
    %cst_12 = arith.constant -1.000000e+09 : f32
    %19 = vector.broadcast %cst_12 : f32 to vector<2x8xf32>
    %20 = arith.select %18, %14, %19 : vector<2x8xi1>, vector<2x8xf32>
    %c0_13 = arith.constant 0 : index
    %c0_14 = arith.constant 0 : index
    %21 = vector.load %arg6[%c0_13, %c0_14] : memref<2x8xf32, #tpu.memory_space<vmem>>, vector<2x8xf32>
    tpu.vector_store %arg6[%c0_13, %c0_14], %20 {strides = array<i32>} : memref<2x8xf32, #tpu.memory_space<vmem>>, vector<2x8xf32>,
    return
  }
  func.func @transform_0(%arg0: i32) -> (i32, i32) {
    %c0_i32 = arith.constant 0 : i32
    %c0_i32_0 = arith.constant 0 : i32
    return %arg0, %c0_i32 : i32, i32
  }
  func.func @transform_1(%arg0: i32) -> (i32, i32) {
    %c0_i32 = arith.constant 0 : i32
    %c0_i32_0 = arith.constant 0 : i32
    return %arg0, %c0_i32 : i32, i32
  }
  func.func @transform_2(%arg0: i32) -> (i32, i32, i32) {
    %c0_i32 = arith.constant 0 : i32
    %c0_i32_0 = arith.constant 0 : i32
    %c0_i32_1 = arith.constant 0 : i32
    return %arg0, %c0_i32, %c0_i32_0 : i32, i32, i32
  }
  func.func @transform_3(%arg0: i32) -> (i32, i32) {
    %c0_i32 = arith.constant 0 : i32
    %c0_i32_0 = arith.constant 0 : i32
    %c0_i32_1 = arith.constant 0 : i32
    return %c0_i32, %c0_i32_0 : i32, i32
  }
  func.func @transform_4(%arg0: i32) -> (i32, i32) {
    %c0_i32 = arith.constant 0 : i32
    %c0_i32_0 = arith.constant 0 : i32
    %c0_i32_1 = arith.constant 0 : i32
    return %c0_i32, %c0_i32_0 : i32, i32
  }
  func.func @transform_5(%arg0: i32) -> (i32, i32) {
    %c0_i32 = arith.constant 0 : i32
    %c0_i32_0 = arith.constant 0 : i32
    return %arg0, %c0_i32 : i32, i32
  }
}

</mosaic_0001>

<bundles_post_ra>
// kernel: tpu_custom_call.1
= control target key start
LH: loop header
LB: loop body
LE: loop exit
PB: predicated region body
PF: predicated region fallthrough
CT: control target
= control target key end

     0   :  { %10 = vsyncpa [#allocation3], 0  ;;  %s416_s0 = inlined_call_operand.vmem [shape: s32[2,1], index: 0, kind: input, shape index: {}]   ;;  %s417_s1 = inlined_call_operand.vmem [shape: f32[2,32], index: 1, kind: input, shape index: {}]   ;;  %s418_s2 = inlined_call_operand.hbm [shape: f32[2,8,32], index: 2, kind: input, shape index: {}]   ;;  %s419_s3 = inlined_call_operand.hbm [shape: f32[32,32], index: 3, kind: input, shape index: {}]   ;;  %s420_s4 = inlined_call_operand.vmem [shape: f32[1,32], index: 4, kind: input, shape index: {}]   ;;  %s421_s5 = inlined_call_operand.hbm [shape: f32[2,8], index: 5, kind: output, shape index: {}]  }
   0x1   :  { %11 = vsyncpa [#allocation6], 0 }
   0x2   :  { %12 = vsyncpa [#allocation4], 0  ;;  %s352_s18 = smov [#allocation2]  }
   0x3   :  { %s22_s19 = sshll.u32 %s352_s18, 4  ;;  %s23_s19 = int_to_ptr.vmem [resolvable:$true] %s22_s19 }
   0x4   :  { %s294_s20 = scalar_lea.vmem %s23_s19, 256  ;;  %p299_p1 = scmp.lt.s32.totalorder %s23_s19, %s23_s19 }
   0x5   :  { %p295_p0 = scmp.ne.s32.totalorder %s23_s19, %s294_s20  ;;  %p300_p2 = scmp.lt.s32.totalorder %s294_s20, %s294_s20 }
   0x7   :  { %p301_p3 = por %p300_p2, %p299_p1 }
   0x9   :  { %p302_p4 = pnand %p301_p3, %p295_p0 }
   0xb   :  { %305 = shalt.err (!%p302_p4)
}
   0xc   :  { %s353_s21 = smov 128   ;;  %s354_s22 = smov 8  }
   0xd   :  { %28 = dma.hbm_to_vmem [thread:$0]  %s418_s2, 256, %s23_s19, [#allocation3], %s353_s21, %s353_s21, %s354_s22  }
   0xe   :  { %s355_s25 = smov [#allocation5]  }
   0xf   :  { %s34_s26 = sshll.u32 %s355_s25, 4  ;;  %s35_s26 = int_to_ptr.vmem [resolvable:$true] %s34_s26 }
  0x10   :  { %s314_s27 = scalar_lea.vmem %s35_s26, 512  ;;  %p319_p6 = scmp.lt.s32.totalorder %s35_s26, %s35_s26 }
  0x11   :  { %p315_p5 = scmp.ne.s32.totalorder %s35_s26, %s314_s27  ;;  %p320_p7 = scmp.lt.s32.totalorder %s314_s27, %s314_s27 }
  0x13   :  { %p321_p8 = por %p320_p7, %p319_p6 }
  0x15   :  { %p322_p9 = pnand %p321_p8, %p315_p5 }
  0x17   :  { %325 = shalt.err (!%p322_p9)
}
  0x18   :  { %40 = dma.hbm_to_vmem [thread:$0]  %s419_s3, 512, %s35_s26, [#allocation6], %s353_s21, %s353_s21, %s354_s22  }
  0x19   :  { %346 = dma.done.wait [#allocation3], 256  }
  0x1a   :  { %347 = vsyncadd [#allocation3], 4294967040 }
  0x1b   :  { %348 = dma.done.wait [#allocation6], 512  }
  0x1c   :  { %349 = vsyncadd [#allocation6], 4294966784  ;;  %v356_v0 = vmov 0.0   ;;  %vm357_vm0 = vmmov 0   ;;  %vm54_vm1 = vcmask 261120   ;;  %v53_v1 = vld [vmem:[#allocation5 + $0x18] sm:$0xff]  ;;  %v158_v11 = vlaneseq }
  0x1d   :  { %264 = vmatprep.subr.mxu0 %v356_v0  ;;  %272 = vmatprep.mubr.msk.f32.mxu0 %vm357_vm0, %v356_v0  ;;  %v52_v2 = vld [vmem:[#allocation5 + $0x10] sm:$0xff]  ;;  %v51_v3 = vld [vmem:[#allocation5 + $0x8] sm:$0xff]  ;;  %v50_v4 = vld [vmem:[#allocation5] sm:$0xff]  ;;  %vm148_vm2 = vcmask 254976   ;;  %v358_v9 = vmov 1966171168  }
  0x1e   :  { %265 = vmatpush3.xpose.msk.msra.mxu0 %vm54_vm1, %v53_v1  ;;  %v49_v5 = vld [vmem:[%s417_s1] sm:$0x3]  ;;  %v156_v10 = vunpack.c.l.s4 %v358_v9  ;;  %v159_v13 = vshrl.u32 %v158_v11, 7  ;;  %v153_v24 = vld [vmem:[#allocation2 + $0x8] sm:$0xff]  ;;  %v359_v30 = vmov 0   ;;  %v209_v40 = vand.u32 127, %v158_v11 }
  0x1f   :  { %266 = vmatprep.subr.mxu0 %v356_v0  ;;  %v258_v6 = vld [vmem:[%s420_s4] ss:$0 sm:$0xff]  ;;  %284 = vset.pattern.permute.xlu1 %v359_v30  ;;  %vm231_vm3 = vcmask 1041409   ;;  %s360_s7 = smov [#allocation7]   ;;  %vm235_vm4 = vcmask 58368  }
  0x20   :  { %v147_v7 = vmul.f32 %v258_v6, %v49_v5  ;;  %v157_v12 = vunpack.c.0.s8 %v156_v10  ;;  %v179_v17 = vsub.s32 0, %v159_v13  ;;  %v152_v21 = vld [vmem:[#allocation2] sm:$0xff]  ;;  %285 = vset.pattern.permute.xlu0 %v359_v30  ;;  %v202_v32 = vsub.s32 1, %v159_v13  ;;  %s243_s8 = sshll.u32 %s360_s7, 4  ;;  %s244_s8 = int_to_ptr.vmem [resolvable:$true] %s243_s8 }
  0x21   :  { %v210_v39 = vld [vmem:[%s416_s0] sm:$0x3]  ;;  %v225_v41 = vsub.s32 %v209_v40, %v159_v13  ;;  %s326_s9 = scalar_lea.vmem %s244_s8, 32  ;;  %p331_p11 = scmp.lt.s32.totalorder %s244_s8, %s244_s8 }
  0x22   :  { %267 = vmatpush3.xpose.msk.msra.mxu0 %vm54_vm1, %v52_v2  ;;  %v149_v8 = vsel %vm148_vm2, %v147_v7, 0.0  ;;  %v160_v14 = vsub.s32 %v157_v12, %v159_v13  ;;  %p327_p10 = scmp.ne.s32.totalorder %s244_s8, %s326_s9  ;;  %p332_p12 = scmp.lt.s32.totalorder %s326_s9, %s326_s9 }
  0x23   :  { %268 = vmatprep.subr.mxu0 %v356_v0  ;;  %150 = vadd.xlane.f32.xlu0 %v149_v8 }
  0x24   :  { %p333_p13 = por %p332_p12, %p331_p11 }
  0x26   :  { %269 = vmatpush3.xpose.msk.msra.mxu0 %vm54_vm1, %v51_v3  ;;  %p334_p0 = pnand %p333_p13, %p327_p10 }
  0x27   :  { %270 = vmatprep.subr.mxu0 %v356_v0 }
  0x2a   :  { %271 = vmatpush3.xpose.msk.msra.mxu0 %vm54_vm1, %v50_v4 }
  0x2d   :  { %273 = vmatmul.mubr.msk.f32.vlgmr.msra.gmra.mxu0 %vm54_vm1, %v49_v5 }
  0xac   :  { %v151_v31 = vpop.xlane.xlu0 %150 }
  0xad   :  { %v199_v33 = vrot.slane %v151_v31, %v179_v17  ;;  %v203_v35 = vrot.slane %v151_v31, %v202_v32 }
  0xed   :  { %v136_v15 = vpop.f32.mrf.mxu0 }
  0xee   :  { %v161_v16 = vrot.slane %v136_v15, %v160_v14 }
  0xef   :  { %v274_v18 = vpop.f32.mrf.mxu0 }
  0xf0   :  { %v162_v19 = vcombine.high %v161_v16, %v161_v16  ;;  %v169_v20 = vrot.slane %v161_v16, %v160_v14 }
  0xf2   :  { %v176_v22 = vrot.slane %v162_v19, %v160_v14  ;;  %v180_v23 = vrot.slane %v169_v20, %v179_v17 }
  0xf4   :  { %v187_v25 = vmul.f32 %v180_v23, %v152_v21  ;;  %v184_v26 = vrot.slane %v176_v22, %v179_v17 }
  0xf6   :  { %v189_v27 = vsel %vm54_vm1, %v187_v25, 0.0  ;;  %v188_v28 = vmul.f32 %v184_v26, %v153_v24 }
  0xf7   :  { %190 = vadd.xlane.f32.xlu0 %v189_v27 }
  0xf8   :  { %v192_v29 = vsel %vm54_vm1, %v188_v28, 0.0 }
  0xf9   :  { %193 = vadd.xlane.f32.xlu1 %v192_v29 }
 0x180   :  { %v191_v34 = vpop.xlane.xlu0 %190 }
 0x181   :  { %v206_v36 = vadd.f32 %v199_v33, %v191_v34 }
 0x182   :  { %v194_v37 = vpop.xlane.xlu1 %193 }
 0x183   :  { %v207_v38 = vadd.f32 %v203_v35, %v194_v37  ;;  %218 = vperm.xlu1 %284, %v206_v36  }
 0x185   :  { %221 = vperm.xlu0 %285, %v207_v38  }
 0x187   :  { %212 = vperm.xlu1 %284, %v210_v39  }
 0x1fe   :  { %v219_v42 = vpop.permute.xlu1 %218 }
 0x1ff   :  { %v226_v44 = vrot.slane %v219_v42, %v225_v41 }
 0x200   :  { %v222_v43 = vpop.permute.xlu0 %221 }
 0x201   :  { %v230_v45 = vrot.slane %v222_v43, %v225_v41 }
 0x202   :  { %v213_v46 = vpop.permute.xlu1 %212 }
 0x203   :  { %v232_v47 = vsel %vm231_vm3, %v230_v45, %v226_v44  ;;  %vm214_vm5 = vcmp.lt.s32.totalorder %v209_v40, %v213_v46 }
 0x204   :  { %v234_v48 = vsel %vm214_vm5, %v232_v47, -1e+09 }
 0x205   :  { %236 = vst.msk [vmem:[#allocation7] sm:$0x3] %vm235_vm4, %v234_v48 }
 0x206   :  { %337 = shalt.err (!%p334_p0)
}
 0x207   :  { %246 = dma.vmem_to_hbm [thread:$0]  %s244_s8, 32, %s421_s5, [#allocation4]  }
 0x208   :  { %350 = dma.done.wait [#allocation4], 32  }
 0x209   :  { %351 = vsyncadd [#allocation4], 4294967264 }
 0x20a   :  { %250 = vsyncpa [#allocation3], 1 }
 0x20b   :  { %251 = vsyncpa [#allocation6], 1 }
 0x20c   :  { %252 = vsyncpa [#allocation4], 1 }

</bundles_post_ra>
